<compile_context>
chip_gen: v7x
topology: tpu7x:2x2x1
jax: 0.10.0
libtpu: 0.0.40
codegen_flags: <defaults>
</compile_context>

<pallas_src>
import functools

import jax
import jax.numpy as jnp
from jax import lax
from jax.experimental import pallas as pl
from jax.experimental.pallas import tpu as pltpu


def attention_kernel(x_ref, wq_ref, wk_ref, wv_ref, wo_ref, b_ref, o_ref,
                     *, heads, dim_head):
    """One grid step handles a block of `bb` batch elements.

    x_ref  : (bb, N, D)     input tokens (bf16)
    wq_ref : (D, inner)     fused Q projection, softmax scale pre-folded (bf16)
    wk_ref : (D, inner)     fused K projection (bf16)
    wv_ref : (D, inner)     fused V projection (bf16)
    wo_ref : (inner, D)     output projection (bf16, head-major rows)
    b_ref  : (1, D)         output projection bias (f32)
    o_ref  : (bb, N, D)     output
    """
    bb, n, d = x_ref.shape

    # Flatten batch-block and sequence for the position-independent projections.
    xf = x_ref[...].reshape(bb * n, d)                                      # (bb*n, D) bf16

    # Fused, lane-dense projections across all heads (one MXU pass each).
    q_all = jnp.dot(xf, wq_ref[...], preferred_element_type=jnp.float32)   # (bb*n, inner)
    v_all = jnp.dot(xf, wv_ref[...], preferred_element_type=jnp.float32)   # (bb*n, inner)
    # K emitted already transposed -> no per-head transposes for q @ k^T.
    kT_all = lax.dot_general(wk_ref[...], xf, (((0,), (1,)), ((), ())),
                             preferred_element_type=jnp.float32)           # (inner, bb*n)

    # bf16 MXU operands; softmax / accumulation stay f32.
    q_all = q_all.astype(jnp.bfloat16)
    kT_all = kT_all.astype(jnp.bfloat16)
    v_all = v_all.astype(jnp.bfloat16)

    # Attention core: tiny (n, n) tiles, fully unrolled over (batch-in-block, head).
    per_batch = []
    for b in range(bb):
        rows = slice(b * n, (b + 1) * n)
        head_outs = []
        for h in range(heads):
            cols = slice(h * dim_head, (h + 1) * dim_head)
            sim = jnp.dot(q_all[rows, cols], kT_all[cols, rows],
                          preferred_element_type=jnp.float32)               # (n, n) f32
            # Numerically stable softmax; divide goes to the EUP slot.
            sim = sim - jnp.max(sim, axis=-1, keepdims=True)
            p = jnp.exp(sim)
            p = p * pl.reciprocal(jnp.sum(p, axis=-1, keepdims=True), approx=True)
            head_outs.append(jnp.dot(p.astype(jnp.bfloat16), v_all[rows, cols],
                                     preferred_element_type=jnp.float32))   # (n, dh)
        # Lane concat in head-major order == the PyTorch 'b h n d -> b n (h d)'.
        per_batch.append(jnp.concatenate(head_outs, axis=-1))               # (n, inner)
    hcat = per_batch[0] if bb == 1 else jnp.concatenate(per_batch, axis=0)  # (bb*n, inner)

    # Single K=inner output projection + bias; one lane-dense store of the result.
    out = jnp.dot(hcat.astype(jnp.bfloat16), wo_ref[...],
                  preferred_element_type=jnp.float32) + b_ref[...]          # (bb*n, D)
    o_ref[...] = out.reshape(bb, n, d).astype(o_ref.dtype)


def prepare_attention_params(wqkv, wout, bout, *, heads, dim_head,
                             compute_dtype=jnp.bfloat16):
    """One-time host-side repack (hoisted out of the per-call path).

    wqkv: (D, 3*inner) with columns ordered (qkv-chunk, head, dh) -- matches
    the PyTorch to_qkv layout. wout: (inner, D). bout: (D,).
    """
    d, three_inner = wqkv.shape
    inner = heads * dim_head
    assert three_inner == 3 * inner
    scale = dim_head ** -0.5
    wq = (wqkv[:, :inner] * jnp.asarray(scale, wqkv.dtype)).astype(compute_dtype)
    wk = wqkv[:, inner:2 * inner].astype(compute_dtype)
    wv = wqkv[:, 2 * inner:].astype(compute_dtype)
    wo = wout.astype(compute_dtype)            # rows already head-major: (h d) -> D
    bias = bout.reshape(1, d).astype(jnp.float32)
    return wq, wk, wv, wo, bias


def _default_batch_block(batch):
    """Single-TC chips (v5e/v6e): collapse to one grid step. Multi-TC (v7x,
    v4/v5p megacore): keep >=2 'parallel' grid steps so every core gets work."""
    try:
        kind = jax.devices()[0].device_kind.lower()
    except Exception:  # pragma: no cover - defensive; assume multi-core
        kind = ""
    single_tc = any(s in kind for s in
                    ("v5e", "v5 lite", "v5lite", "v6e", "v6 lite", "v6lite"))
    if single_tc:
        return batch
    return max(1, batch // 2)


def attention_withoutmask(x, params, *, heads, dim_head, batch_block=None,
                          compute_dtype=jnp.bfloat16):
    """x: (B, N, D) f32; params from prepare_attention_params."""
    wq, wk, wv, wo, bias = params
    B, N, D = x.shape
    inner = heads * dim_head

    bb = batch_block if batch_block is not None else _default_batch_block(B)
    bb = max(1, min(bb, B))
    while B % bb:           # keep the grid exact (tiny B -> trivial search)
        bb -= 1
    grid = (B // bb,)

    kernel = functools.partial(attention_kernel, heads=heads, dim_head=dim_head)

    return pl.pallas_call(
        kernel,
        out_shape=jax.ShapeDtypeStruct((B, N, D), x.dtype),
        grid_spec=pltpu.PrefetchScalarGridSpec(
            num_scalar_prefetch=0,
            grid=grid,
            in_specs=[
                pl.BlockSpec((bb, N, D), lambda g: (g, 0, 0)),     # x (bf16)
                pl.BlockSpec((D, inner), lambda g: (0, 0)),        # Wq (scale folded)
                pl.BlockSpec((D, inner), lambda g: (0, 0)),        # Wk
                pl.BlockSpec((D, inner), lambda g: (0, 0)),        # Wv
                pl.BlockSpec((inner, D), lambda g: (0, 0)),        # Wout
                pl.BlockSpec((1, D), lambda g: (0, 0)),            # bias
            ],
            out_specs=pl.BlockSpec((bb, N, D), lambda g: (g, 0, 0)),
        ),
        compiler_params=pltpu.CompilerParams(
            dimension_semantics=("parallel",)),
    )(x.astype(compute_dtype), wq, wk, wv, wo, bias)


def reference(x, wqkv, wout, bout, *, heads, dim_head):
    """Pure-JAX f32 reference of the PyTorch forward pass (correctness check)."""
    B, N, D = x.shape
    inner = heads * dim_head
    scale = dim_head ** -0.5

    qkv = x @ wqkv                                           # (B, N, 3*inner)
    q, k, v = jnp.split(qkv, 3, axis=-1)

    def to_heads(t):  # b n (h d) -> b h n d
        return t.reshape(B, N, heads, dim_head).transpose(0, 2, 1, 3)

    q, k, v = map(to_heads, (q, k, v))
    sim = jnp.einsum('bhid,bhjd->bhij', q, k) * scale
    attn = jax.nn.softmax(sim, axis=-1)
    out = jnp.einsum('bhij,bhjd->bhid', attn, v)
    out = out.transpose(0, 2, 1, 3).reshape(B, N, inner)     # b n (h d)
    return out @ wout + bout


if __name__ == "__main__":
    # Small shapes consistent with the module defaults (heads=8, dim_head=16).
    batch, seq, dim = 2, 8, 32
    heads, dim_head = 8, 16
    inner = heads * dim_head                                 # 128

    key = jax.random.PRNGKey(0)
    kx, kqkv, kwo, kbo = jax.random.split(key, 4)

    x = jax.random.normal(kx, (batch, seq, dim), dtype=jnp.float32)

    # nn.Linear weights stored pre-transposed as (in, out) so kernels do x @ W.
    wqkv = jax.random.normal(kqkv, (dim, 3 * inner), dtype=jnp.float32) * 0.05
    wout = jax.random.normal(kwo, (inner, dim), dtype=jnp.float32) * 0.05
    bout = jax.random.normal(kbo, (dim,), dtype=jnp.float32) * 0.05

    # One-time weight repack (kept out of the per-call path).
    params = prepare_attention_params(wqkv, wout, bout, heads=heads, dim_head=dim_head)

    out = attention_withoutmask(x, params, heads=heads, dim_head=dim_head)
    out = jax.block_until_ready(out)

    ref = reference(x, wqkv, wout, bout, heads=heads, dim_head=dim_head)
    assert out.shape == (batch, seq, dim), out.shape
    # Tolerance accounts for bf16 MXU operands + the EUP approximate reciprocal.
    assert jnp.allclose(out, ref, rtol=1e-2, atol=1e-2), (
        "mismatch vs reference, max abs err = "
        + str(float(jnp.max(jnp.abs(out - ref)))))

    print("KERNEL_OK")
</pallas_src>

<mosaic_0001>
module attributes {stable_mosaic.version = 11 : i64} {
  func.func @attention_kernel(%arg0: i32, %arg1: memref<1x8x32xbf16, #tpu.memory_space<vmem>>, %arg2: memref<32x128xbf16, #tpu.memory_space<vmem>>, %arg3: memref<32x128xbf16, #tpu.memory_space<vmem>>, %arg4: memref<32x128xbf16, #tpu.memory_space<vmem>>, %arg5: memref<128x32xbf16, #tpu.memory_space<vmem>>, %arg6: memref<1x32xf32, #tpu.memory_space<vmem>>, %arg7: memref<1x8x32xf32, #tpu.memory_space<vmem>>) attributes {dimension_semantics = [#tpu.dimension_semantics<parallel>], iteration_bounds = array<i64: 2>, scalar_prefetch = 0 : i64, scratch_operands = 0 : i64, tpu.core_type = #tpu.core_type<tc>, window_params = [{transform_indices = @transform_0, window_bounds = array<i64: 1, 8, 32>}, {pipeline_mode = #tpu.pipeline_mode<synchronous>, transform_indices = @transform_1, window_bounds = array<i64: 32, 128>}, {pipeline_mode = #tpu.pipeline_mode<synchronous>, transform_indices = @transform_2, window_bounds = array<i64: 32, 128>}, {pipeline_mode = #tpu.pipeline_mode<synchronous>, transform_indices = @transform_3, window_bounds = array<i64: 32, 128>}, {pipeline_mode = #tpu.pipeline_mode<synchronous>, transform_indices = @transform_4, window_bounds = array<i64: 128, 32>}, {pipeline_mode = #tpu.pipeline_mode<synchronous>, transform_indices = @transform_5, window_bounds = array<i64: 1, 32>}, {transform_indices = @transform_6, window_bounds = array<i64: 1, 8, 32>}]} {
    %c0 = arith.constant 0 : index
    %c0_0 = arith.constant 0 : index
    %c0_1 = arith.constant 0 : index
    %0 = vector.load %arg1[%c0, %c0_0, %c0_1] : memref<1x8x32xbf16, #tpu.memory_space<vmem>>, vector<1x8x32xbf16>
    %1 = vector.shape_cast %0 : vector<1x8x32xbf16> to vector<8x32xbf16>
    %c0_2 = arith.constant 0 : index
    %c0_3 = arith.constant 0 : index
    %2 = vector.load %arg2[%c0_2, %c0_3] : memref<32x128xbf16, #tpu.memory_space<vmem>>, vector<32x128xbf16>
    %cst = arith.constant dense<0.000000e+00> : vector<8x128xf32>
    %3 = tpu.matmul %1, %2, %cst {dimension_numbers = #tpu.dot_dimension_numbers<[1], [0], [0], [1], [0, 0, 1, 1], [], []>} : vector<8x32xbf16>, vector<32x128xbf16>, vector<8x128xf32> -> vector<8x128xf32>
    %c0_4 = arith.constant 0 : index
    %c0_5 = arith.constant 0 : index
    %4 = vector.load %arg4[%c0_4, %c0_5] : memref<32x128xbf16, #tpu.memory_space<vmem>>, vector<32x128xbf16>
    %cst_6 = arith.constant dense<0.000000e+00> : vector<8x128xf32>
    %5 = tpu.matmul %1, %4, %cst_6 {dimension_numbers = #tpu.dot_dimension_numbers<[1], [0], [0], [1], [0, 0, 1, 1], [], []>} : vector<8x32xbf16>, vector<32x128xbf16>, vector<8x128xf32> -> vector<8x128xf32>
    %c0_7 = arith.constant 0 : index
    %c0_8 = arith.constant 0 : index
    %6 = vector.load %arg3[%c0_7, %c0_8] : memref<32x128xbf16, #tpu.memory_space<vmem>>, vector<32x128xbf16>
    %cst_9 = arith.constant dense<0.000000e+00> : vector<128x8xf32>
    %7 = tpu.matmul %6, %1, %cst_9 {dimension_numbers = #tpu.dot_dimension_numbers<[0], [1], [1], [0], [0, 1, 1, 0], [], []>} : vector<32x128xbf16>, vector<8x32xbf16>, vector<128x8xf32> -> vector<128x8xf32>
    %8 = arith.truncf %3 : vector<8x128xf32> to vector<8x128xbf16>
    %9 = arith.truncf %7 : vector<128x8xf32> to vector<128x8xbf16>
    %10 = arith.truncf %5 : vector<8x128xf32> to vector<8x128xbf16>
    %11 = vector.extract_strided_slice %8 {offsets = [0, 0], sizes = [8, 16], strides = [1, 1]} : vector<8x128xbf16> to vector<8x16xbf16>
    %12 = vector.extract_strided_slice %9 {offsets = [0, 0], sizes = [16, 8], strides = [1, 1]} : vector<128x8xbf16> to vector<16x8xbf16>
    %cst_10 = arith.constant dense<0.000000e+00> : vector<8x8xf32>
    %13 = tpu.matmul %11, %12, %cst_10 {dimension_numbers = #tpu.dot_dimension_numbers<[1], [0], [0], [1], [0, 0, 1, 1], [], []>} : vector<8x16xbf16>, vector<16x8xbf16>, vector<8x8xf32> -> vector<8x8xf32>
    %cst_11 = arith.constant dense<0xFF800000> : vector<8xf32>
    %14 = vector.multi_reduction <maximumf>, %13, %cst_11 [1] : vector<8x8xf32> to vector<8xf32>
    %15 = vector.shape_cast %14 : vector<8xf32> to vector<8x1xf32>
    %16 = vector.broadcast %15 : vector<8x1xf32> to vector<8x8xf32>
    %17 = arith.subf %13, %16 : vector<8x8xf32>
    %18 = math.exp %17 : vector<8x8xf32>
    %cst_12 = arith.constant dense<0.000000e+00> : vector<8xf32>
    %19 = vector.multi_reduction <add>, %18, %cst_12 [1] : vector<8x8xf32> to vector<8xf32>
    %20 = vector.shape_cast %19 : vector<8xf32> to vector<8x1xf32>
    %21 = tpu.reciprocal %20 {approx = true} : vector<8x1xf32> -> vector<8x1xf32>
    %22 = vector.broadcast %21 : vector<8x1xf32> to vector<8x8xf32>
    %23 = arith.mulf %18, %22 : vector<8x8xf32>
    %24 = arith.truncf %23 : vector<8x8xf32> to vector<8x8xbf16>
    %25 = vector.extract_strided_slice %10 {offsets = [0, 0], sizes = [8, 16], strides = [1, 1]} : vector<8x128xbf16> to vector<8x16xbf16>
    %cst_13 = arith.constant dense<0.000000e+00> : vector<8x16xf32>
    %26 = tpu.matmul %24, %25, %cst_13 {dimension_numbers = #tpu.dot_dimension_numbers<[1], [0], [0], [1], [0, 0, 1, 1], [], []>} : vector<8x8xbf16>, vector<8x16xbf16>, vector<8x16xf32> -> vector<8x16xf32>
    %27 = vector.extract_strided_slice %8 {offsets = [0, 16], sizes = [8, 16], strides = [1, 1]} : vector<8x128xbf16> to vector<8x16xbf16>
    %28 = vector.extract_strided_slice %9 {offsets = [16, 0], sizes = [16, 8], strides = [1, 1]} : vector<128x8xbf16> to vector<16x8xbf16>
    %cst_14 = arith.constant dense<0.000000e+00> : vector<8x8xf32>
    %29 = tpu.matmul %27, %28, %cst_14 {dimension_numbers = #tpu.dot_dimension_numbers<[1], [0], [0], [1], [0, 0, 1, 1], [], []>} : vector<8x16xbf16>, vector<16x8xbf16>, vector<8x8xf32> -> vector<8x8xf32>
    %cst_15 = arith.constant dense<0xFF800000> : vector<8xf32>
    %30 = vector.multi_reduction <maximumf>, %29, %cst_15 [1] : vector<8x8xf32> to vector<8xf32>
    %31 = vector.shape_cast %30 : vector<8xf32> to vector<8x1xf32>
    %32 = vector.broadcast %31 : vector<8x1xf32> to vector<8x8xf32>
    %33 = arith.subf %29, %32 : vector<8x8xf32>
    %34 = math.exp %33 : vector<8x8xf32>
    %cst_16 = arith.constant dense<0.000000e+00> : vector<8xf32>
    %35 = vector.multi_reduction <add>, %34, %cst_16 [1] : vector<8x8xf32> to vector<8xf32>
    %36 = vector.shape_cast %35 : vector<8xf32> to vector<8x1xf32>
    %37 = tpu.reciprocal %36 {approx = true} : vector<8x1xf32> -> vector<8x1xf32>
    %38 = vector.broadcast %37 : vector<8x1xf32> to vector<8x8xf32>
    %39 = arith.mulf %34, %38 : vector<8x8xf32>
    %40 = arith.truncf %39 : vector<8x8xf32> to vector<8x8xbf16>
    %41 = vector.extract_strided_slice %10 {offsets = [0, 16], sizes = [8, 16], strides = [1, 1]} : vector<8x128xbf16> to vector<8x16xbf16>
    %cst_17 = arith.constant dense<0.000000e+00> : vector<8x16xf32>
    %42 = tpu.matmul %40, %41, %cst_17 {dimension_numbers = #tpu.dot_dimension_numbers<[1], [0], [0], [1], [0, 0, 1, 1], [], []>} : vector<8x8xbf16>, vector<8x16xbf16>, vector<8x16xf32> -> vector<8x16xf32>
    %43 = vector.extract_strided_slice %8 {offsets = [0, 32], sizes = [8, 16], strides = [1, 1]} : vector<8x128xbf16> to vector<8x16xbf16>
    %44 = vector.extract_strided_slice %9 {offsets = [32, 0], sizes = [16, 8], strides = [1, 1]} : vector<128x8xbf16> to vector<16x8xbf16>
    %cst_18 = arith.constant dense<0.000000e+00> : vector<8x8xf32>
    %45 = tpu.matmul %43, %44, %cst_18 {dimension_numbers = #tpu.dot_dimension_numbers<[1], [0], [0], [1], [0, 0, 1, 1], [], []>} : vector<8x16xbf16>, vector<16x8xbf16>, vector<8x8xf32> -> vector<8x8xf32>
    %cst_19 = arith.constant dense<0xFF800000> : vector<8xf32>
    %46 = vector.multi_reduction <maximumf>, %45, %cst_19 [1] : vector<8x8xf32> to vector<8xf32>
    %47 = vector.shape_cast %46 : vector<8xf32> to vector<8x1xf32>
    %48 = vector.broadcast %47 : vector<8x1xf32> to vector<8x8xf32>
    %49 = arith.subf %45, %48 : vector<8x8xf32>
    %50 = math.exp %49 : vector<8x8xf32>
    %cst_20 = arith.constant dense<0.000000e+00> : vector<8xf32>
    %51 = vector.multi_reduction <add>, %50, %cst_20 [1] : vector<8x8xf32> to vector<8xf32>
    %52 = vector.shape_cast %51 : vector<8xf32> to vector<8x1xf32>
    %53 = tpu.reciprocal %52 {approx = true} : vector<8x1xf32> -> vector<8x1xf32>
    %54 = vector.broadcast %53 : vector<8x1xf32> to vector<8x8xf32>
    %55 = arith.mulf %50, %54 : vector<8x8xf32>
    %56 = arith.truncf %55 : vector<8x8xf32> to vector<8x8xbf16>
    %57 = vector.extract_strided_slice %10 {offsets = [0, 32], sizes = [8, 16], strides = [1, 1]} : vector<8x128xbf16> to vector<8x16xbf16>
    %cst_21 = arith.constant dense<0.000000e+00> : vector<8x16xf32>
    %58 = tpu.matmul %56, %57, %cst_21 {dimension_numbers = #tpu.dot_dimension_numbers<[1], [0], [0], [1], [0, 0, 1, 1], [], []>} : vector<8x8xbf16>, vector<8x16xbf16>, vector<8x16xf32> -> vector<8x16xf32>
    %59 = vector.extract_strided_slice %8 {offsets = [0, 48], sizes = [8, 16], strides = [1, 1]} : vector<8x128xbf16> to vector<8x16xbf16>
    %60 = vector.extract_strided_slice %9 {offsets = [48, 0], sizes = [16, 8], strides = [1, 1]} : vector<128x8xbf16> to vector<16x8xbf16>
    %cst_22 = arith.constant dense<0.000000e+00> : vector<8x8xf32>
    %61 = tpu.matmul %59, %60, %cst_22 {dimension_numbers = #tpu.dot_dimension_numbers<[1], [0], [0], [1], [0, 0, 1, 1], [], []>} : vector<8x16xbf16>, vector<16x8xbf16>, vector<8x8xf32> -> vector<8x8xf32>
    %cst_23 = arith.constant dense<0xFF800000> : vector<8xf32>
    %62 = vector.multi_reduction <maximumf>, %61, %cst_23 [1] : vector<8x8xf32> to vector<8xf32>
    %63 = vector.shape_cast %62 : vector<8xf32> to vector<8x1xf32>
    %64 = vector.broadcast %63 : vector<8x1xf32> to vector<8x8xf32>
    %65 = arith.subf %61, %64 : vector<8x8xf32>
    %66 = math.exp %65 : vector<8x8xf32>
    %cst_24 = arith.constant dense<0.000000e+00> : vector<8xf32>
    %67 = vector.multi_reduction <add>, %66, %cst_24 [1] : vector<8x8xf32> to vector<8xf32>
    %68 = vector.shape_cast %67 : vector<8xf32> to vector<8x1xf32>
    %69 = tpu.reciprocal %68 {approx = true} : vector<8x1xf32> -> vector<8x1xf32>
    %70 = vector.broadcast %69 : vector<8x1xf32> to vector<8x8xf32>
    %71 = arith.mulf %66, %70 : vector<8x8xf32>
    %72 = arith.truncf %71 : vector<8x8xf32> to vector<8x8xbf16>
    %73 = vector.extract_strided_slice %10 {offsets = [0, 48], sizes = [8, 16], strides = [1, 1]} : vector<8x128xbf16> to vector<8x16xbf16>
    %cst_25 = arith.constant dense<0.000000e+00> : vector<8x16xf32>
    %74 = tpu.matmul %72, %73, %cst_25 {dimension_numbers = #tpu.dot_dimension_numbers<[1], [0], [0], [1], [0, 0, 1, 1], [], []>} : vector<8x8xbf16>, vector<8x16xbf16>, vector<8x16xf32> -> vector<8x16xf32>
    %75 = vector.extract_strided_slice %8 {offsets = [0, 64], sizes = [8, 16], strides = [1, 1]} : vector<8x128xbf16> to vector<8x16xbf16>
    %76 = vector.extract_strided_slice %9 {offsets = [64, 0], sizes = [16, 8], strides = [1, 1]} : vector<128x8xbf16> to vector<16x8xbf16>
    %cst_26 = arith.constant dense<0.000000e+00> : vector<8x8xf32>
    %77 = tpu.matmul %75, %76, %cst_26 {dimension_numbers = #tpu.dot_dimension_numbers<[1], [0], [0], [1], [0, 0, 1, 1], [], []>} : vector<8x16xbf16>, vector<16x8xbf16>, vector<8x8xf32> -> vector<8x8xf32>
    %cst_27 = arith.constant dense<0xFF800000> : vector<8xf32>
    %78 = vector.multi_reduction <maximumf>, %77, %cst_27 [1] : vector<8x8xf32> to vector<8xf32>
    %79 = vector.shape_cast %78 : vector<8xf32> to vector<8x1xf32>
    %80 = vector.broadcast %79 : vector<8x1xf32> to vector<8x8xf32>
    %81 = arith.subf %77, %80 : vector<8x8xf32>
    %82 = math.exp %81 : vector<8x8xf32>
    %cst_28 = arith.constant dense<0.000000e+00> : vector<8xf32>
    %83 = vector.multi_reduction <add>, %82, %cst_28 [1] : vector<8x8xf32> to vector<8xf32>
    %84 = vector.shape_cast %83 : vector<8xf32> to vector<8x1xf32>
    %85 = tpu.reciprocal %84 {approx = true} : vector<8x1xf32> -> vector<8x1xf32>
    %86 = vector.broadcast %85 : vector<8x1xf32> to vector<8x8xf32>
    %87 = arith.mulf %82, %86 : vector<8x8xf32>
    %88 = arith.truncf %87 : vector<8x8xf32> to vector<8x8xbf16>
    %89 = vector.extract_strided_slice %10 {offsets = [0, 64], sizes = [8, 16], strides = [1, 1]} : vector<8x128xbf16> to vector<8x16xbf16>
    %cst_29 = arith.constant dense<0.000000e+00> : vector<8x16xf32>
    %90 = tpu.matmul %88, %89, %cst_29 {dimension_numbers = #tpu.dot_dimension_numbers<[1], [0], [0], [1], [0, 0, 1, 1], [], []>} : vector<8x8xbf16>, vector<8x16xbf16>, vector<8x16xf32> -> vector<8x16xf32>
    %91 = vector.extract_strided_slice %8 {offsets = [0, 80], sizes = [8, 16], strides = [1, 1]} : vector<8x128xbf16> to vector<8x16xbf16>
    %92 = vector.extract_strided_slice %9 {offsets = [80, 0], sizes = [16, 8], strides = [1, 1]} : vector<128x8xbf16> to vector<16x8xbf16>
    %cst_30 = arith.constant dense<0.000000e+00> : vector<8x8xf32>
    %93 = tpu.matmul %91, %92, %cst_30 {dimension_numbers = #tpu.dot_dimension_numbers<[1], [0], [0], [1], [0, 0, 1, 1], [], []>} : vector<8x16xbf16>, vector<16x8xbf16>, vector<8x8xf32> -> vector<8x8xf32>
    %cst_31 = arith.constant dense<0xFF800000> : vector<8xf32>
    %94 = vector.multi_reduction <maximumf>, %93, %cst_31 [1] : vector<8x8xf32> to vector<8xf32>
    %95 = vector.shape_cast %94 : vector<8xf32> to vector<8x1xf32>
    %96 = vector.broadcast %95 : vector<8x1xf32> to vector<8x8xf32>
    %97 = arith.subf %93, %96 : vector<8x8xf32>
    %98 = math.exp %97 : vector<8x8xf32>
    %cst_32 = arith.constant dense<0.000000e+00> : vector<8xf32>
    %99 = vector.multi_reduction <add>, %98, %cst_32 [1] : vector<8x8xf32> to vector<8xf32>
    %100 = vector.shape_cast %99 : vector<8xf32> to vector<8x1xf32>
    %101 = tpu.reciprocal %100 {approx = true} : vector<8x1xf32> -> vector<8x1xf32>
    %102 = vector.broadcast %101 : vector<8x1xf32> to vector<8x8xf32>
    %103 = arith.mulf %98, %102 : vector<8x8xf32>
    %104 = arith.truncf %103 : vector<8x8xf32> to vector<8x8xbf16>
    %105 = vector.extract_strided_slice %10 {offsets = [0, 80], sizes = [8, 16], strides = [1, 1]} : vector<8x128xbf16> to vector<8x16xbf16>
    %cst_33 = arith.constant dense<0.000000e+00> : vector<8x16xf32>
    %106 = tpu.matmul %104, %105, %cst_33 {dimension_numbers = #tpu.dot_dimension_numbers<[1], [0], [0], [1], [0, 0, 1, 1], [], []>} : vector<8x8xbf16>, vector<8x16xbf16>, vector<8x16xf32> -> vector<8x16xf32>
    %107 = vector.extract_strided_slice %8 {offsets = [0, 96], sizes = [8, 16], strides = [1, 1]} : vector<8x128xbf16> to vector<8x16xbf16>
    %108 = vector.extract_strided_slice %9 {offsets = [96, 0], sizes = [16, 8], strides = [1, 1]} : vector<128x8xbf16> to vector<16x8xbf16>
    %cst_34 = arith.constant dense<0.000000e+00> : vector<8x8xf32>
    %109 = tpu.matmul %107, %108, %cst_34 {dimension_numbers = #tpu.dot_dimension_numbers<[1], [0], [0], [1], [0, 0, 1, 1], [], []>} : vector<8x16xbf16>, vector<16x8xbf16>, vector<8x8xf32> -> vector<8x8xf32>
    %cst_35 = arith.constant dense<0xFF800000> : vector<8xf32>
    %110 = vector.multi_reduction <maximumf>, %109, %cst_35 [1] : vector<8x8xf32> to vector<8xf32>
    %111 = vector.shape_cast %110 : vector<8xf32> to vector<8x1xf32>
    %112 = vector.broadcast %111 : vector<8x1xf32> to vector<8x8xf32>
    %113 = arith.subf %109, %112 : vector<8x8xf32>
    %114 = math.exp %113 : vector<8x8xf32>
    %cst_36 = arith.constant dense<0.000000e+00> : vector<8xf32>
    %115 = vector.multi_reduction <add>, %114, %cst_36 [1] : vector<8x8xf32> to vector<8xf32>
    %116 = vector.shape_cast %115 : vector<8xf32> to vector<8x1xf32>
    %117 = tpu.reciprocal %116 {approx = true} : vector<8x1xf32> -> vector<8x1xf32>
    %118 = vector.broadcast %117 : vector<8x1xf32> to vector<8x8xf32>
    %119 = arith.mulf %114, %118 : vector<8x8xf32>
    %120 = arith.truncf %119 : vector<8x8xf32> to vector<8x8xbf16>
    %121 = vector.extract_strided_slice %10 {offsets = [0, 96], sizes = [8, 16], strides = [1, 1]} : vector<8x128xbf16> to vector<8x16xbf16>
    %cst_37 = arith.constant dense<0.000000e+00> : vector<8x16xf32>
    %122 = tpu.matmul %120, %121, %cst_37 {dimension_numbers = #tpu.dot_dimension_numbers<[1], [0], [0], [1], [0, 0, 1, 1], [], []>} : vector<8x8xbf16>, vector<8x16xbf16>, vector<8x16xf32> -> vector<8x16xf32>
    %123 = vector.extract_strided_slice %8 {offsets = [0, 112], sizes = [8, 16], strides = [1, 1]} : vector<8x128xbf16> to vector<8x16xbf16>
    %124 = vector.extract_strided_slice %9 {offsets = [112, 0], sizes = [16, 8], strides = [1, 1]} : vector<128x8xbf16> to vector<16x8xbf16>
    %cst_38 = arith.constant dense<0.000000e+00> : vector<8x8xf32>
    %125 = tpu.matmul %123, %124, %cst_38 {dimension_numbers = #tpu.dot_dimension_numbers<[1], [0], [0], [1], [0, 0, 1, 1], [], []>} : vector<8x16xbf16>, vector<16x8xbf16>, vector<8x8xf32> -> vector<8x8xf32>
    %cst_39 = arith.constant dense<0xFF800000> : vector<8xf32>
    %126 = vector.multi_reduction <maximumf>, %125, %cst_39 [1] : vector<8x8xf32> to vector<8xf32>
    %127 = vector.shape_cast %126 : vector<8xf32> to vector<8x1xf32>
    %128 = vector.broadcast %127 : vector<8x1xf32> to vector<8x8xf32>
    %129 = arith.subf %125, %128 : vector<8x8xf32>
    %130 = math.exp %129 : vector<8x8xf32>
    %cst_40 = arith.constant dense<0.000000e+00> : vector<8xf32>
    %131 = vector.multi_reduction <add>, %130, %cst_40 [1] : vector<8x8xf32> to vector<8xf32>
    %132 = vector.shape_cast %131 : vector<8xf32> to vector<8x1xf32>
    %133 = tpu.reciprocal %132 {approx = true} : vector<8x1xf32> -> vector<8x1xf32>
    %134 = vector.broadcast %133 : vector<8x1xf32> to vector<8x8xf32>
    %135 = arith.mulf %130, %134 : vector<8x8xf32>
    %136 = arith.truncf %135 : vector<8x8xf32> to vector<8x8xbf16>
    %137 = vector.extract_strided_slice %10 {offsets = [0, 112], sizes = [8, 16], strides = [1, 1]} : vector<8x128xbf16> to vector<8x16xbf16>
    %cst_41 = arith.constant dense<0.000000e+00> : vector<8x16xf32>
    %138 = tpu.matmul %136, %137, %cst_41 {dimension_numbers = #tpu.dot_dimension_numbers<[1], [0], [0], [1], [0, 0, 1, 1], [], []>} : vector<8x8xbf16>, vector<8x16xbf16>, vector<8x16xf32> -> vector<8x16xf32>
    %139 = tpu.concatenate %26, %42, %58, %74, %90, %106, %122, %138 in 1 : vector<8x16xf32>, vector<8x16xf32>, vector<8x16xf32>, vector<8x16xf32>, vector<8x16xf32>, vector<8x16xf32>, vector<8x16xf32>, vector<8x16xf32> -> vector<8x128xf32>
    %140 = arith.truncf %139 : vector<8x128xf32> to vector<8x128xbf16>
    %c0_42 = arith.constant 0 : index
    %c0_43 = arith.constant 0 : index
    %141 = vector.load %arg5[%c0_42, %c0_43] : memref<128x32xbf16, #tpu.memory_space<vmem>>, vector<128x32xbf16>
    %cst_44 = arith.constant dense<0.000000e+00> : vector<8x32xf32>
    %142 = tpu.matmul %140, %141, %cst_44 {dimension_numbers = #tpu.dot_dimension_numbers<[1], [0], [0], [1], [0, 0, 1, 1], [], []>} : vector<8x128xbf16>, vector<128x32xbf16>, vector<8x32xf32> -> vector<8x32xf32>
    %c0_45 = arith.constant 0 : index
    %c0_46 = arith.constant 0 : index
    %143 = vector.load %arg6[%c0_45, %c0_46] : memref<1x32xf32, #tpu.memory_space<vmem>>, vector<1x32xf32>
    %144 = vector.broadcast %143 : vector<1x32xf32> to vector<8x32xf32>
    %145 = arith.addf %142, %144 : vector<8x32xf32>
    %146 = vector.shape_cast %145 : vector<8x32xf32> to vector<1x8x32xf32>
    %c0_47 = arith.constant 0 : index
    %c0_48 = arith.constant 0 : index
    %c0_49 = arith.constant 0 : index
    %147 = vector.load %arg7[%c0_47, %c0_48, %c0_49] : memref<1x8x32xf32, #tpu.memory_space<vmem>>, vector<1x8x32xf32>
    tpu.vector_store %arg7[%c0_47, %c0_48, %c0_49], %146 {strides = array<i32>} : memref<1x8x32xf32, #tpu.memory_space<vmem>>, vector<1x8x32xf32>,
    return
  }
  func.func @transform_0(%arg0: i32) -> (i32, i32, i32) {
    %c0_i32 = arith.constant 0 : i32
    %c0_i32_0 = arith.constant 0 : i32
    %c0_i32_1 = arith.constant 0 : i32
    return %arg0, %c0_i32, %c0_i32_0 : i32, i32, i32
  }
  func.func @transform_1(%arg0: i32) -> (i32, i32) {
    %c0_i32 = arith.constant 0 : i32
    %c0_i32_0 = arith.constant 0 : i32
    %c0_i32_1 = arith.constant 0 : i32
    return %c0_i32, %c0_i32_0 : i32, i32
  }
  func.func @transform_2(%arg0: i32) -> (i32, i32) {
    %c0_i32 = arith.constant 0 : i32
    %c0_i32_0 = arith.constant 0 : i32
    %c0_i32_1 = arith.constant 0 : i32
    return %c0_i32, %c0_i32_0 : i32, i32
  }
  func.func @transform_3(%arg0: i32) -> (i32, i32) {
    %c0_i32 = arith.constant 0 : i32
    %c0_i32_0 = arith.constant 0 : i32
    %c0_i32_1 = arith.constant 0 : i32
    return %c0_i32, %c0_i32_0 : i32, i32
  }
  func.func @transform_4(%arg0: i32) -> (i32, i32) {
    %c0_i32 = arith.constant 0 : i32
    %c0_i32_0 = arith.constant 0 : i32
    %c0_i32_1 = arith.constant 0 : i32
    return %c0_i32, %c0_i32_0 : i32, i32
  }
  func.func @transform_5(%arg0: i32) -> (i32, i32) {
    %c0_i32 = arith.constant 0 : i32
    %c0_i32_0 = arith.constant 0 : i32
    %c0_i32_1 = arith.constant 0 : i32
    return %c0_i32, %c0_i32_0 : i32, i32
  }
  func.func @transform_6(%arg0: i32) -> (i32, i32, i32) {
    %c0_i32 = arith.constant 0 : i32
    %c0_i32_0 = arith.constant 0 : i32
    %c0_i32_1 = arith.constant 0 : i32
    return %arg0, %c0_i32, %c0_i32_0 : i32, i32, i32
  }
}

</mosaic_0001>

<bundles_post_ra>
// kernel: tpu_custom_call.1
= control target key start
LH: loop header
LB: loop body
LE: loop exit
PB: predicated region body
PF: predicated region fallthrough
CT: control target
= control target key end

     0   :  { %11 = vsyncpa [#allocation3], 0  ;;  %s2407_s0 = inlined_call_operand.vmem [shape: bf16[2,8,32], index: 0, kind: input, shape index: {}]   ;;  %s2408_s1 = inlined_call_operand.vmem [shape: bf16[32,128], index: 1, kind: input, shape index: {}]   ;;  %s2409_s2 = inlined_call_operand.vmem [shape: bf16[32,128], index: 2, kind: input, shape index: {}]   ;;  %s2410_s3 = inlined_call_operand.vmem [shape: bf16[32,128], index: 3, kind: input, shape index: {}]   ;;  %s2411_s4 = inlined_call_operand.vmem [shape: bf16[128,32], index: 4, kind: input, shape index: {}]   ;;  %s2412_s5 = inlined_call_operand.vmem [shape: f32[1,32], index: 5, kind: input, shape index: {}]   ;;  %s2413_s6 = inlined_call_operand.hbm [shape: f32[2,8,32], index: 6, kind: output, shape index: {}]  }
   0x1   :  { %13 = vsyncpa [#allocation3 + $0x1], 0  ;;  %s2060_s21 = smov 0   ;;  %s2062_s22 = smov 0  }
   0x2   :  { %s2064_s23 = smov 0   ;;  %s2066_s24 = smov 0  }
   0x3 LB: > { %s2081_s25 = sadd.s32 4294967295, %s2013_s24   ;;  %s1595_s26 = sadd.s32 4294967294, %s2013_s24   ;;  %s2013_s24 = sphi %s2066_s24, %s2419_s24   ;;  %s2009_s23 = sphi %s2064_s23, %s2418_s23   ;;  %s2005_s22 = sphi %s2062_s22, %s2417_s22   ;;  %s2001_s21 = sphi %s2060_s21, %s2416_s21  }
   0x4   : > { %s2085_s27 = sadd.s32 1, %s2013_s24   ;;  %s157_s28 = sadd.s32 1, %s2009_s23 }
   0x5   : > { %s154_s29 = ssub.s32 %s2013_s24, %s2085_s27  ;;  %p167_p0 = scmp.ne.s32.totalorder %s2009_s23, %s2005_s22 }
   0x6   : > { %p155_p1 = scmp.eq.s32.totalorder %s154_s29, 0  ;;  %p168_p2 = scmp.eq.s32.totalorder %s2081_s25, 1 }
   0x7   : > { %p173_p3 = scmp.ne.s32.totalorder %s2005_s22, %s2001_s21  ;;  %p174_p4 = scmp.eq.s32.totalorder %s1595_s26, 1 }
   0x8   : > { %s2096_s30 = scalar_select %p155_p1, %s2009_s23, %s157_s28  }
   0x9   : > { %p2098_p5 = por %p168_p2, %p167_p0  ;;  %p2102_p6 = por %p174_p4, %p173_p3 }
   0xa   : > { %p1598_p7 = scmp.ge.s32.totalorder %s2013_s24, 1  ;;  %p214_p8 = scmp.lt.s32.totalorder %s2013_s24, 3 }
   0xc   : > { %p215_p9 = pnand %p1598_p7, %p214_p8 }
   0xd   : > { %v1905_v0 = vld [vmem:[%s2409_s2] sm:$0xff] (!%p215_p9)   ;;  %v1906_v1 = vld [vmem:[%s2409_s2 + $0x8] sm:$0xff] (!%p215_p9)   ;;  %v2015_v2 = vmov (!%p215_p9), 0.0   ;;  %vm2016_vm0 = vmmov (!%p215_p9), 0   ;;  %p243_p10 = scmp.lt.s32.totalorder (!%p215_p9), %s2081_s25, 1  ;;  %vm265_vm1 = vcmask (!%p215_p9), 261120  }
   0xe   : > { %218 = sbr.rel (%p215_p9) target bundleno = 2038 (0x7f6), region = 44  ;;  %1702 = vmatprep.subr.bf16.mxu0 (!%p215_p9), %v2015_v2  ;;  %1710 = vmatprep.subr.bf16.mxu1 (!%p215_p9), %v2015_v2  ;;  %v1907_v3 = vld [vmem:[%s2408_s1] sm:$0xff] (!%p215_p9)   ;;  %v1908_v4 = vld [vmem:[%s2408_s1 + $0x8] sm:$0xff] (!%p215_p9)   ;;  %s2017_s11 = smov (!%p215_p9), 112   ;;  %vm588_vm2 = vcmask (!%p215_p9), 1043456   ;;  %vm528_vm3 = vcmask (!%p215_p9), 130048  }
   0xf   : > { %381 = vxpose.xlu0.c.b16.start [1/2] (short) (!%p215_p9), %v1905_v0, 128  ;;  %1706 = vmatprep.mubr.msk.bf16.mxu0 (!%p215_p9), %vm2016_vm0, %v2015_v2  ;;  %v1909_v5 = vld [vmem:[%s2410_s3] sm:$0xff] (!%p215_p9)   ;;  %v1910_v6 = vld [vmem:[%s2410_s3 + $0x8] sm:$0xff] (!%p215_p9)   ;;  %s2018_s12 = smov (!%p215_p9), 16   ;;  %vm572_vm4 = vcmask (!%p215_p9), 64512   ;;  %s2019_s13 = smov (!%p215_p9), 96   ;;  %vm1399_vm5 = vcmask (!%p215_p9), 392192  }
  0x10   : > { %1714 = vmatprep.mubr.msk.bf16.mxu1 (!%p215_p9), %vm2016_vm0, %v2015_v2  ;;  %1703 = vmatpush3.bf16.msra.mxu0 (!%p215_p9), %v1907_v3  ;;  %s2020_s14 = smov (!%p215_p9), 80   ;;  %s2021_s15 = smov (!%p215_p9), 64   ;;  %vm1401_vm6 = vcmask (!%p215_p9), 523264   ;;  %vm1403_vm7 = vcmask (!%p215_p9), 654336   ;;  %vm1405_vm8 = vcmask (!%p215_p9), 785408   ;;  %vm1407_vm9 = vcmask (!%p215_p9), 916480  }
  0x11   : > { %1704 = vmatprep.subr.bf16.mxu0 (!%p215_p9), %v2015_v2  ;;  %1711 = vmatpush3.bf16.msra.mxu1 (!%p215_p9), %v1909_v5  ;;  %s2022_s16 = smov (!%p215_p9), 48   ;;  %s1643_s29 = sshll.u32 (!%p215_p9), %s2081_s25, 7 }
  0x12   : > { %1712 = vmatprep.subr.bf16.mxu1 (!%p215_p9), %v2015_v2  ;;  %s2024_s19 = smov (!%p215_p9), [#allocation2]  }
  0x13   : > { %382 = vxpose.xlu0.c.b16.end [2/2] (short) (!%p215_p9), %v1906_v1, 128 }
  0x14   : > { %1705 = vmatpush3.bf16.msra.mxu0 (!%p215_p9), %v1908_v4 }
  0x15   : > { %s244_s17 = scalar_select %p243_p10, %s2081_s25, 1  ;;  %1713 = vmatpush3.bf16.msra.mxu1 %v1910_v6 }
  0x17   : > { %s1600_s20 = sshll.u32 %s244_s17, 2  ;;  %s2023_s17 = smov 32  }
  0x18   : > { %s246_s10 = scalar_lea.vmem %s2407_s0, %s1600_s20 }
  0x19   : > { %v248_v7 = vld [vmem:[%s246_s10] sm:$0xf] }
  0x1a   : > { %1854 = vmatprep.subr.msk.bf16.mxu0 %vm265_vm1, %v248_v7  ;;  %1707 = vmatmul.mubr.msk.bf16.vlgmr.msra.gmra.mrb[0].mxu0 %vm265_vm1, %v248_v7  ;;  %v267_v8 = vsel %vm265_vm1, %v248_v7, 0 }
  0x1b   : > { %1855 = vmatprep.subr.msk.bf16.mxu1 %vm265_vm1, %v248_v7  ;;  %1715 = vmatmul.mubr.msk.bf16.vlgmr.msra.gmra.mrb[0].mxu1 %vm265_vm1, %v248_v7 }
  0x1d   : > { %1719 = vmatpush3.bf16.xpose.msra.mxu0 %v267_v8 }
  0x1e   : > { %1760 = vmatprep.subr.bf16.mxu0 %v2015_v2  ;;  %1853 = vmatpush3.bf16.xpose.msra.mxu1 %v267_v8 }
  0x1f   : > { %1736 = vmatprep.subr.bf16.mxu1 %v2015_v2 }
  0x75   : > { %v389_v9 = vpop.trf.xlu0 }
  0x76   : > { %1720 = vmatprep.mubr.msk.bf16.mxu0 %vm265_vm1, %v389_v9 }
  0x79   : > { %v390_v10 = vpop.trf.xlu0 }
  0x7a   : > { %1721 = vmatmul.mubr.msk.bf16.vlgmr.msra.gmra.mrb[4].mxu0 %vm265_vm1, %v390_v10 }
  0x7d   : > { %v391_v11 = vpop.trf.xlu0 }
  0x7e   : > { %1724 = vmatprep.mubr.msk.bf16.mxu0 %vm265_vm1, %v391_v11 }
  0x81   : > { %v392_v12 = vpop.trf.xlu0 }
  0x82   : > { %1725 = vmatmul.mubr.msk.bf16.gmra.mrb[8].mxu0 %vm265_vm1, %v392_v12 }
  0x83   : > { %1762 = vmatprep.mubr.msk.bf16.mxu0 %vm2016_vm0, %v2015_v2 }
  0x85   : > { %v393_v13 = vpop.trf.xlu0 }
  0x86   : > { %1728 = vmatprep.mubr.msk.bf16.mxu1 %vm265_vm1, %v393_v13 }
  0x89   : > { %v394_v14 = vpop.trf.xlu0 }
  0x8a   : > { %1729 = vmatmul.mubr.msk.bf16.vlgmr.msra.gmra.mrb[4].mxu1 %vm265_vm1, %v394_v14 }
  0x8d   : > { %v395_v15 = vpop.trf.xlu0 }
  0x8e   : > { %1732 = vmatprep.mubr.msk.bf16.mxu1 %vm265_vm1, %v395_v15 }
  0x91   : > { %v396_v16 = vpop.trf.xlu0 }
  0x92   : > { %1733 = vmatmul.mubr.msk.bf16.gmra.mrb[8].mxu1 %vm265_vm1, %v396_v16 }
  0x93   : > { %1738 = vmatprep.mubr.msk.bf16.mxu1 %vm2016_vm0, %v2015_v2 }
  0xed   : > { %v303_v17 = vpop.f32.mrb[0].mxu0 }
  0xee   : > { %v2158_v18 = vpack.c.bf16 %v303_v17, %v303_v17  ;;  %v1708_v19 = vpop.f32.mrb[1].mxu0  ;;  %v359_v22 = vpop.f32.mrb[0].mxu1 }
  0xef   : > { %v306_v20 = vpop.f32.mrb[2].mxu0  ;;  %v1716_v23 = vpop.f32.mrb[1].mxu1  ;;  %v2170_v31 = vpack.c.bf16 %v359_v22, %v359_v22 }
  0xf0   : > { %633 = vrot.lane.b32.xlu0 %v2158_v18, %s2017_s11  ;;  %v1709_v21 = vpop.f32.mrb[3].mxu0  ;;  %v362_v24 = vpop.f32.mrb[2].mxu1 }
  0xf1   : > { %v1717_v25 = vpop.f32.mrb[3].mxu1  ;;  %v590_v33 = vsel %vm588_vm2, %v2170_v31, 0 }
  0xf4   : > { %1264 = vrot.lane.b32.xlu0 %v2158_v18, %s2018_s12 }
 0x14d   : > { %v2164_v26 = vpop.f32.mrb[4].mxu0 }
 0x14e   : > { %v455_v27 = vpop.f32.mrb[5].mxu0 }
 0x14f   : > { %v2166_v28 = vpop.f32.mrb[6].mxu0 }
 0x150   : > { %v520_v29 = vpack.c.bf16 %v2166_v28, %v2164_v26  ;;  %v458_v30 = vpop.f32.mrb[7].mxu0 }
 0x151   : > { %v519_v32 = vpack.c.bf16 %v458_v30, %v455_v27 }
 0x153   : > { %1737 = vmatpush3.bf16.msra.mxu1 %v519_v32 }
 0x154   : > { %1742 = vmatprep.subr.bf16.mxu1 %v2015_v2 }
 0x155   : > { %v1726_v34 = vpop.f32.mrb[8].mxu0 }
 0x156   : > { %1739 = vmatmul.mubr.msk.bf16.vlgmr.msra.gmra.mrb[12].mxu1 %vm528_vm3, %v2158_v18  ;;  %v471_v35 = vpop.f32.mrb[9].mxu0 }
 0x157   : > { %v1727_v36 = vpop.f32.mrb[10].mxu0  ;;  %1743 = vmatpush3.bf16.msra.mxu1 %v590_v33  ;;  %1744 = vmatprep.mubr.msk.bf16.mxu1 %vm2016_vm0, %v2015_v2 }
 0x158   : > { %v522_v37 = vpack.c.bf16 %v1727_v36, %v1726_v34  ;;  %v474_v38 = vpop.f32.mrb[11].mxu0  ;;  %1748 = vmatprep.subr.bf16.mxu1 %v2015_v2 }
 0x159   : > { %v521_v39 = vpack.c.bf16 %v474_v38, %v471_v35 }
 0x15b   : > { %1761 = vmatpush3.bf16.msra.mxu0 %v521_v39 }
 0x15c   : > { %1772 = vmatprep.subr.bf16.mxu0 %v2015_v2 }
 0x15d   : > { %v1730_v40 = vpop.f32.mrb[4].mxu1 }
 0x15e   : > { %v487_v41 = vpop.f32.mrb[5].mxu1 }
 0x15f   : > { %v1731_v42 = vpop.f32.mrb[6].mxu1 }
 0x160   : > { %v524_v43 = vpack.c.bf16 %v1731_v42, %v1730_v40  ;;  %v490_v44 = vpop.f32.mrb[7].mxu1 }
 0x161   : > { %v523_v45 = vpack.c.bf16 %v490_v44, %v487_v41 }
 0x162   : > { %v634_v6 = vpop.permute.xlu0 %633 }
 0x165   : > { %v2181_v46 = vpop.f32.mrb[8].mxu1 }
 0x166   : > { %v503_v47 = vpop.f32.mrb[9].mxu1  ;;  %v1265_v9 = vpop.permute.xlu0 %1264 }
 0x167   : > { %v1735_v48 = vpop.f32.mrb[10].mxu1 }
 0x168   : > { %v526_v49 = vpack.c.bf16 %v1735_v48, %v2181_v46  ;;  %v506_v50 = vpop.f32.mrb[11].mxu1 }
 0x169   : > { %v525_v51 = vpack.c.bf16 %v506_v50, %v503_v47 }
 0x229   : > { %v566_v52 = vpop.f32.mrb[12].mxu1 }
 0x22a   : > { %v1740_v53 = vpop.f32.mrb[13].mxu1  ;;  %v573_v54 = vsel %vm572_vm4, %v566_v52, -inf }
 0x22b   : > { %574 = vmax.xlane.f32.xlu1 %v573_v54  ;;  %v569_v55 = vpop.f32.mrb[14].mxu1 }
 0x22c   : > { %v1741_v56 = vpop.f32.mrb[15].mxu1 }
 0x2b8   : > { %v575_v57 = vpop.xlane.xlu1 %574 }
 0x2b9   : > { %v576_v58 = vsub.f32 %v566_v52, %v575_v57 }
 0x2bb   : > { %v577_v59 = vmul.f32 1.442695, %v576_v58 }
 0x2bd   : > { %1919 = vpow2.f32 %v577_v59 }
 0x2c7   : > { %v1920_v60 = vpop.eup %1919 }
 0x2c8   : > { %v579_v61 = vsel %vm572_vm4, %v1920_v60, 0.0 }
 0x2c9   : > { %580 = vadd.xlane.f32.xlu1 %v579_v61 }
 0x2da   : > { %739 = vrot.lane.b32.xlu1 %v2158_v18, %s2019_s13 }
 0x2de   : > { %844 = vrot.lane.b32.xlu1 %v2158_v18, %s2020_s14 }
 0x2e2   : > { %949 = vrot.lane.b32.xlu1 %v2158_v18, %s2021_s15 }
 0x2e6   : > { %1054 = vrot.lane.b32.xlu1 %v2158_v18, %s2022_s16 }
 0x2ea   : > { %1159 = vrot.lane.b32.xlu1 %v2158_v18, %s2023_s17 }
 0x356   : > { %v581_v62 = vpop.xlane.xlu1 %580 }
 0x357   : > { %1921 = vrcp.f32 %v581_v62 }
 0x35a   : > { %v740_v63 = vpop.permute.xlu1 %739 }
 0x35b   : > { %1763 = vmatmul.mubr.msk.bf16.vlgmr.msra.gmra.mrb[12].mxu0 %vm528_vm3, %v740_v63 }
 0x35c   : > { %1773 = vmatpush3.bf16.msra.mxu0 %v522_v37  ;;  %1774 = vmatprep.mubr.msk.bf16.mxu0 %vm2016_vm0, %v2015_v2 }
 0x35d   : > { %1784 = vmatprep.subr.bf16.mxu0 %v2015_v2 }
 0x35e   : > { %v845_v3 = vpop.permute.xlu1 %844 }
 0x361   : > { %v1922_v0 = vpop.eup %1921 }
 0x362   : > { %v583_v1 = vmul.f32 %v1922_v0, %v1920_v60  ;;  %v950_v5 = vpop.permute.xlu1 %949 }
 0x363   : > { %1775 = vmatmul.mubr.msk.bf16.vlgmr.msra.gmra.mrb[16].mxu0 %vm528_vm3, %v845_v3 }
 0x364   : > { %1785 = vmatpush3.bf16.msra.mxu0 %v523_v45  ;;  %v584_v4 = vpack.c.bf16 %v583_v1, %v583_v1  ;;  %1786 = vmatprep.mubr.msk.bf16.mxu0 %vm2016_vm0, %v2015_v2 }
 0x365   : > { %1796 = vmatprep.subr.bf16.mxu0 %v2015_v2 }
 0x366   : > { %1745 = vmatmul.mubr.msk.bf16.vlgmr.msra.gmra.mrb[16].mxu1 %vm572_vm4, %v584_v4  ;;  %v1055_v7 = vpop.permute.xlu1 %1054 }
 0x367   : > { %1749 = vmatpush3.bf16.msra.mxu1 %v520_v29  ;;  %1750 = vmatprep.mubr.msk.bf16.mxu1 %vm2016_vm0, %v2015_v2 }
 0x368   : > { %1754 = vmatprep.subr.bf16.mxu1 %v2015_v2 }
 0x36a   : > { %v1160_v8 = vpop.permute.xlu1 %1159 }
 0x36b   : > { %1787 = vmatmul.mubr.msk.bf16.vlgmr.msra.gmra.mrb[20].mxu0 %vm528_vm3, %v950_v5 }
 0x36c   : > { %1797 = vmatpush3.bf16.msra.mxu0 %v524_v43  ;;  %1798 = vmatprep.mubr.msk.bf16.mxu0 %vm2016_vm0, %v2015_v2 }
 0x36d   : > { %1808 = vmatprep.subr.bf16.mxu0 %v2015_v2 }
 0x36e   : > { %1751 = vmatmul.mubr.msk.bf16.vlgmr.msra.gmra.mrb[20].mxu1 %vm528_vm3, %v634_v6 }
 0x36f   : > { %1756 = vmatprep.mubr.msk.bf16.mxu1 %vm2016_vm0, %v2015_v2 }
 0x373   : > { %1799 = vmatmul.mubr.msk.bf16.vlgmr.msra.gmra.mrb[24].mxu0 %vm528_vm3, %v1055_v7 }
 0x374   : > { %1809 = vmatpush3.bf16.msra.mxu0 %v525_v51  ;;  %1810 = vmatprep.mubr.msk.bf16.mxu0 %vm2016_vm0, %v2015_v2 }
 0x375   : > { %1820 = vmatprep.subr.bf16.mxu0 %v2015_v2 }
 0x37b   : > { %1811 = vmatmul.mubr.msk.bf16.vlgmr.msra.gmra.mrb[28].mxu0 %vm528_vm3, %v1160_v8 }
 0x37c   : > { %1821 = vmatpush3.bf16.msra.mxu0 %v526_v49  ;;  %1822 = vmatprep.mubr.msk.bf16.mxu0 %vm2016_vm0, %v2015_v2 }
 0x37d   : > { %1832 = vmatprep.subr.bf16.mxu0 %v2015_v2 }
 0x383   : > { %1823 = vmatmul.mubr.msk.bf16.vlgmr.msra.gmra.mrb[32].mxu0 %vm528_vm3, %v1265_v9 }
 0x384   : > { %1848 = vmatprep.mubr.msk.bf16.mxu0 %vm2016_vm0, %v2015_v2 }
 0x42e   : > { %v778_v10 = vpop.f32.mrb[12].mxu0 }
 0x42f   : > { %v1764_v11 = vpop.f32.mrb[13].mxu0  ;;  %v784_v12 = vsel %vm572_vm4, %v778_v10, -inf }
 0x430   : > { %785 = vmax.xlane.f32.xlu0 %v784_v12  ;;  %v781_v13 = vpop.f32.mrb[14].mxu0 }
 0x431   : > { %v1765_v14 = vpop.f32.mrb[15].mxu0 }
 0x436   : > { %v883_v15 = vpop.f32.mrb[16].mxu0 }
 0x437   : > { %v1776_v16 = vpop.f32.mrb[17].mxu0  ;;  %v889_v17 = vsel %vm572_vm4, %v883_v15, -inf }
 0x438   : > { %890 = vmax.xlane.f32.xlu0 %v889_v17  ;;  %v886_v18 = vpop.f32.mrb[18].mxu0 }
 0x439   : > { %v2231_v19 = vpop.f32.mrb[16].mxu1  ;;  %v1777_v20 = vpop.f32.mrb[19].mxu0 }
 0x43a   : > { %v1746_v21 = vpop.f32.mrb[17].mxu1 }
 0x43b   : > { %v629_v22 = vpop.f32.mrb[18].mxu1 }
 0x43c   : > { %v1747_v23 = vpop.f32.mrb[19].mxu1 }
 0x43e   : > { %v988_v24 = vpop.f32.mrb[20].mxu0 }
 0x43f   : > { %v1788_v25 = vpop.f32.mrb[21].mxu0  ;;  %v994_v35 = vsel %vm572_vm4, %v988_v24, -inf }
 0x440   : > { %v991_v26 = vpop.f32.mrb[22].mxu0 }
 0x441   : > { %v672_v27 = vpop.f32.mrb[20].mxu1  ;;  %v1789_v28 = vpop.f32.mrb[23].mxu0 }
 0x442   : > { %v1752_v29 = vpop.f32.mrb[21].mxu1  ;;  %v678_v30 = vsel %vm572_vm4, %v672_v27, -inf }
 0x443   : > { %679 = vmax.xlane.f32.xlu1 %v678_v30  ;;  %v675_v32 = vpop.f32.mrb[22].mxu1 }
 0x444   : > { %v1753_v33 = vpop.f32.mrb[23].mxu1 }
 0x446   : > { %v1093_v34 = vpop.f32.mrb[24].mxu0 }
 0x447   : > { %995 = vmax.xlane.f32.xlu1 %v994_v35  ;;  %v1800_v36 = vpop.f32.mrb[25].mxu0  ;;  %v1099_v37 = vsel %vm572_vm4, %v1093_v34, -inf }
 0x448   : > { %1100 = vmax.xlane.f32.xlu0 %v1099_v37  ;;  %v1096_v38 = vpop.f32.mrb[26].mxu0 }
 0x449   : > { %v1801_v39 = vpop.f32.mrb[27].mxu0 }
 0x44e   : > { %v1198_v40 = vpop.f32.mrb[28].mxu0 }
 0x44f   : > { %v1812_v41 = vpop.f32.mrb[29].mxu0  ;;  %v1204_v42 = vsel %vm572_vm4, %v1198_v40, -inf }
 0x450   : > { %1205 = vmax.xlane.f32.xlu1 %v1204_v42  ;;  %v1201_v43 = vpop.f32.mrb[30].mxu0 }
 0x451   : > { %v1813_v44 = vpop.f32.mrb[31].mxu0 }
 0x456   : > { %v1303_v45 = vpop.f32.mrb[32].mxu0 }
 0x457   : > { %v1824_v46 = vpop.f32.mrb[33].mxu0  ;;  %v1309_v47 = vsel %vm572_vm4, %v1303_v45, -inf }
 0x458   : > { %1310 = vmax.xlane.f32.xlu0 %v1309_v47  ;;  %v1306_v48 = vpop.f32.mrb[34].mxu0 }
 0x459   : > { %v1825_v49 = vpop.f32.mrb[35].mxu0 }
 0x4bd   : > { %v786_v50 = vpop.xlane.xlu0 %785 }
 0x4be   : > { %v787_v51 = vsub.f32 %v778_v10, %v786_v50 }
 0x4c0   : > { %v788_v52 = vmul.f32 1.442695, %v787_v51 }
 0x4c2   : > { %1923 = vpow2.f32 %v788_v52 }
 0x4c5   : > { %v891_v53 = vpop.xlane.xlu0 %890 }
 0x4c6   : > { %v892_v54 = vsub.f32 %v883_v15, %v891_v53 }
 0x4c8   : > { %v893_v55 = vmul.f32 1.442695, %v892_v54 }
 0x4ca   : > { %1925 = vpow2.f32 %v893_v55 }
 0x4cc   : > { %v2238_v56 = vpop.eup %1923 }
 0x4cd   : > { %v790_v57 = vsel %vm572_vm4, %v2238_v56, 0.0 }
 0x4ce   : > { %791 = vadd.xlane.f32.xlu0 %v790_v57 }
 0x4d0   : > { %v680_v58 = vpop.xlane.xlu1 %679 }
 0x4d1   : > { %v681_v59 = vsub.f32 %v672_v27, %v680_v58 }
 0x4d3   : > { %v682_v60 = vmul.f32 1.442695, %v681_v59 }
 0x4d4   : > { %v2242_v61 = vpop.eup %1925  ;;  %v996_v62 = vpop.xlane.xlu1 %995 }
 0x4d5   : > { %1927 = vpow2.f32 %v682_v60  ;;  %v997_v63 = vsub.f32 %v988_v24, %v996_v62  ;;  %v1101_v0 = vpop.xlane.xlu0 %1100  ;;  %v895_v1 = vsel %vm572_vm4, %v2242_v61, 0.0 }
 0x4d6   : > { %v1102_v3 = vsub.f32 %v1093_v34, %v1101_v0  ;;  %896 = vadd.xlane.f32.xlu1 %v895_v1 }
 0x4d7   : > { %v998_v4 = vmul.f32 1.442695, %v997_v63 }
 0x4d8   : > { %v1103_v5 = vmul.f32 1.442695, %v1102_v3 }
 0x4d9   : > { %1929 = vpow2.f32 %v998_v4 }
 0x4da   : > { %1931 = vpow2.f32 %v1103_v5 }
 0x4dd   : > { %v1206_v12 = vpop.xlane.xlu1 %1205 }
 0x4de   : > { %v1207_v13 = vsub.f32 %v1198_v40, %v1206_v12 }
 0x4df   : > { %v1928_v6 = vpop.eup %1927 }
 0x4e0   : > { %v684_v7 = vsel %vm572_vm4, %v1928_v6, 0.0  ;;  %v1208_v14 = vmul.f32 1.442695, %v1207_v13 }
 0x4e1   : > { %685 = vadd.xlane.f32.xlu1 %v684_v7 }
 0x4e2   : > { %1933 = vpow2.f32 %v1208_v14  ;;  %v1911_v14 = vld [vmem:[%s2411_s4] sm:$0xff]  }
 0x4e3   : > { %v2247_v8 = vpop.eup %1929  ;;  %1833 = vmatpush3.bf16.msra.mxu0 %v1911_v14 }
 0x4e4   : > { %v1000_v9 = vsel %vm572_vm4, %v2247_v8, 0.0  ;;  %v2251_v10 = vpop.eup %1931  ;;  %1834 = vmatprep.subr.bf16.mxu0 %v2015_v2 }
 0x4e5   : > { %1001 = vadd.xlane.f32.xlu0 %v1000_v9  ;;  %v1105_v11 = vsel %vm572_vm4, %v2251_v10, 0.0  ;;  %v1311_v15 = vpop.xlane.xlu0 %1310 }
 0x4e6   : > { %v1312_v16 = vsub.f32 %v1303_v45, %v1311_v15  ;;  %v1912_v15 = vld [vmem:[%s2411_s4 + $0x8] sm:$0xff]  }
 0x4e7   : > { %1835 = vmatpush3.bf16.msra.mxu0 %v1912_v15 }
 0x4e8   : > { %v1313_v17 = vmul.f32 1.442695, %v1312_v16  ;;  %v1913_v16 = vld [vmem:[%s2411_s4 + $0x10] sm:$0xff]   ;;  %1836 = vmatprep.subr.bf16.mxu0 %v2015_v2 }
 0x4e9   : > { %1106 = vadd.xlane.f32.xlu0 %v1105_v11 }
 0x4ea   : > { %1935 = vpow2.f32 %v1313_v17  ;;  %v1914_v17 = vld [vmem:[%s2411_s4 + $0x18] sm:$0xff]  }
 0x4eb   : > { %1837 = vmatpush3.bf16.msra.mxu0 %v1913_v16 }
 0x4ec   : > { %v2261_v18 = vpop.eup %1933  ;;  %1838 = vmatprep.subr.bf16.mxu0 %v2015_v2 }
 0x4ed   : > { %v1210_v20 = vsel %vm572_vm4, %v2261_v18, 0.0 }
 0x4ef   : > { %1839 = vmatpush3.bf16.msra.mxu0 %v1914_v17 }
 0x4f0   : > { %1840 = vmatprep.subr.bf16.mxu0 %v2015_v2 }
 0x4f2   : > { %691 = vrot.lane.b32.xlu1 %v2170_v31, %s2017_s11 }
 0x4f4   : > { %v2265_v21 = vpop.eup %1935 }
 0x4f5   : > { %v1315_v22 = vsel %vm572_vm4, %v2265_v21, 0.0 }
 0x4ff   : > { %796 = vrot.lane.b32.xlu0 %v2170_v31, %s2019_s13 }
 0x503   : > { %901 = vrot.lane.b32.xlu0 %v2170_v31, %s2020_s14 }
 0x516   : > { %1211 = vadd.xlane.f32.xlu1 %v1210_v20 }
 0x522   : > { %1316 = vadd.xlane.f32.xlu0 %v1315_v22 }
 0x527   : > { %1006 = vrot.lane.b32.xlu1 %v2170_v31, %s2021_s15 }
 0x52b   : > { %1216 = vrot.lane.b32.xlu1 %v2170_v31, %s2023_s17 }
 0x52f   : > { %1321 = vrot.lane.b32.xlu1 %v2170_v31, %s2018_s12 }
 0x538   : > { %1111 = vrot.lane.b32.xlu0 %v2170_v31, %s2022_s16 }
 0x55b   : > { %v792_v24 = vpop.xlane.xlu0 %791 }
 0x563   : > { %v897_v23 = vpop.xlane.xlu1 %896 }
 0x56e   : > { %v686_v25 = vpop.xlane.xlu1 %685 }
 0x56f   : > { %1937 = vrcp.f32 %v686_v25  ;;  %v1917_v25 = vld [vmem:[%s2411_s4 + $0x30] sm:$0xff]  }
 0x570   : > { %1939 = vrcp.f32 %v792_v24  ;;  %v1916_v24 = vld [vmem:[%s2411_s4 + $0x28] sm:$0xff]  }
 0x571   : > { %1941 = vrcp.f32 %v897_v23 }
 0x572   : > { %v692_v26 = vpop.permute.xlu1 %691  ;;  %v1002_v27 = vpop.xlane.xlu0 %1001 }
 0x573   : > { %v697_v28 = vsel %vm588_vm2, %v692_v26, 0  ;;  %1943 = vrcp.f32 %v1002_v27 }
 0x574   : > { %1755 = vmatpush3.bf16.msra.mxu1 %v697_v28 }
 0x575   : > { %1766 = vmatprep.subr.bf16.mxu1 %v2015_v2 }
 0x576   : > { %v1107_v29 = vpop.xlane.xlu0 %1106 }
 0x577   : > { %1945 = vrcp.f32 %v1107_v29 }
 0x579   : > { %v1938_v30 = vpop.eup %1937 }
 0x57a   : > { %v688_v32 = vmul.f32 %v1938_v30, %v1928_v6  ;;  %v797_v33 = vpop.permute.xlu0 %796  ;;  %v1940_v35 = vpop.eup %1939  ;;  %v1918_v30 = vld [vmem:[%s2411_s4 + $0x38] sm:$0xff]  }
 0x57b   : > { %v802_v31 = vsel %vm588_vm2, %v797_v33, 0  ;;  %v794_v36 = vmul.f32 %v1940_v35, %v2238_v56  ;;  %v1942_v39 = vpop.eup %1941 }
 0x57c   : > { %v689_v34 = vpack.c.bf16 %v688_v32, %v688_v32  ;;  %v899_v41 = vmul.f32 %v1942_v39, %v2242_v61 }
 0x57d   : > { %v795_v38 = vpack.c.bf16 %v794_v36, %v794_v36  ;;  %v1944_v43 = vpop.eup %1943 }
 0x57e   : > { %1757 = vmatmul.mubr.msk.bf16.vlgmr.msra.gmra.mrb[24].mxu1 %vm572_vm4, %v689_v34  ;;  %v902_v37 = vpop.permute.xlu0 %901  ;;  %v900_v42 = vpack.c.bf16 %v899_v41, %v899_v41  ;;  %v1004_v45 = vmul.f32 %v1944_v43, %v2247_v8 }
 0x57f   : > { %1767 = vmatpush3.bf16.msra.mxu1 %v802_v31  ;;  %1768 = vmatprep.mubr.msk.bf16.mxu1 %vm2016_vm0, %v2015_v2  ;;  %v907_v40 = vsel %vm588_vm2, %v902_v37, 0 }
 0x580   : > { %1778 = vmatprep.subr.bf16.mxu1 %v2015_v2  ;;  %v1005_v48 = vpack.c.bf16 %v1004_v45, %v1004_v45 }
 0x581   : > { %v1946_v49 = vpop.eup %1945 }
 0x582   : > { %v1109_v51 = vmul.f32 %v1946_v49, %v2251_v10 }
 0x584   : > { %v1110_v55 = vpack.c.bf16 %v1109_v51, %v1109_v51 }
 0x586   : > { %1769 = vmatmul.mubr.msk.bf16.vlgmr.msra.gmra.mrb[28].mxu1 %vm572_vm4, %v795_v38 }
 0x587   : > { %1779 = vmatpush3.bf16.msra.mxu1 %v907_v40  ;;  %1780 = vmatprep.mubr.msk.bf16.mxu1 %vm2016_vm0, %v2015_v2 }
 0x588   : > { %1790 = vmatprep.subr.bf16.mxu1 %v2015_v2 }
 0x58e   : > { %1781 = vmatmul.mubr.msk.bf16.vlgmr.msra.gmra.mrb[32].mxu1 %vm572_vm4, %v900_v42 }
 0x58f   : > { %1792 = vmatprep.mubr.msk.bf16.mxu1 %vm2016_vm0, %v2015_v2 }
 0x5a3   : > { %v1212_v44 = vpop.xlane.xlu1 %1211 }
 0x5a4   : > { %1947 = vrcp.f32 %v1212_v44 }
 0x5a7   : > { %v1007_v46 = vpop.permute.xlu1 %1006 }
 0x5a8   : > { %v1012_v47 = vsel %vm588_vm2, %v1007_v46, 0 }
 0x5a9   : > { %1791 = vmatpush3.bf16.msra.mxu1 %v1012_v47 }
 0x5aa   : > { %1802 = vmatprep.subr.bf16.mxu1 %v2015_v2 }
 0x5ab   : > { %v1217_v54 = vpop.permute.xlu1 %1216 }
 0x5ac   : > { %1793 = vmatmul.mubr.msk.bf16.vlgmr.msra.gmra.mrb[36].mxu1 %vm572_vm4, %v1005_v48  ;;  %v1222_v57 = vsel %vm588_vm2, %v1217_v54, 0 }
 0x5ad   : > { %1804 = vmatprep.mubr.msk.bf16.mxu1 %vm2016_vm0, %v2015_v2 }
 0x5ae   : > { %v1948_v56 = vpop.eup %1947 }
 0x5af   : > { %v1317_v50 = vpop.xlane.xlu0 %1316  ;;  %v1214_v58 = vmul.f32 %v1948_v56, %v2261_v18  ;;  %v1322_v59 = vpop.permute.xlu1 %1321 }
 0x5b0   : > { %1949 = vrcp.f32 %v1317_v50  ;;  %v1327_v62 = vsel %vm588_vm2, %v1322_v59, 0 }
 0x5b1   : > { %v1215_v60 = vpack.c.bf16 %v1214_v58, %v1214_v58 }
 0x5b3   : > { %v1112_v52 = vpop.permute.xlu0 %1111 }
 0x5b4   : > { %v1117_v53 = vsel %vm588_vm2, %v1112_v52, 0 }
 0x5b5   : > { %1803 = vmatpush3.bf16.msra.mxu1 %v1117_v53 }
 0x5b6   : > { %1814 = vmatprep.subr.bf16.mxu1 %v2015_v2 }
 0x5b8   : > { %1805 = vmatmul.mubr.msk.bf16.vlgmr.msra.gmra.mrb[40].mxu1 %vm572_vm4, %v1110_v55 }
 0x5b9   : > { %1815 = vmatpush3.bf16.msra.mxu1 %v1222_v57  ;;  %1816 = vmatprep.mubr.msk.bf16.mxu1 %vm2016_vm0, %v2015_v2 }
 0x5ba   : > { %1826 = vmatprep.subr.bf16.mxu1 %v2015_v2  ;;  %v1950_v61 = vpop.eup %1949 }
 0x5bb   : > { %v1319_v63 = vmul.f32 %v1950_v61, %v2265_v21  ;;  %v1915_v21 = vld [vmem:[%s2411_s4 + $0x20] sm:$0xff]  }
 0x5bc   : > { %1841 = vmatpush3.bf16.msra.mxu0 %v1915_v21 }
 0x5bd   : > { %v1320_v0 = vpack.c.bf16 %v1319_v63, %v1319_v63  ;;  %1842 = vmatprep.subr.bf16.mxu0 %v2015_v2 }
 0x5c0   : > { %1817 = vmatmul.mubr.msk.bf16.vlgmr.msra.gmra.mrb[44].mxu1 %vm572_vm4, %v1215_v60  ;;  %1843 = vmatpush3.bf16.msra.mxu0 %v1916_v24 }
 0x5c1   : > { %1827 = vmatpush3.bf16.msra.mxu1 %v1327_v62  ;;  %1828 = vmatprep.mubr.msk.bf16.mxu1 %vm2016_vm0, %v2015_v2 }
 0x5c2   : > { %1844 = vmatprep.subr.bf16.mxu0 %v2015_v2 }
 0x5c4   : > { %1845 = vmatpush3.bf16.msra.mxu0 %v1917_v25 }
 0x5c5   : > { %1846 = vmatprep.subr.bf16.mxu0 %v2015_v2 }
 0x5c8   : > { %1829 = vmatmul.mubr.msk.bf16.vlgmr.msra.gmra.mrb[48].mxu1 %vm572_vm4, %v1320_v0  ;;  %1847 = vmatpush3.bf16.msra.mxu0 %v1918_v30 }
 0x651   : > { %v733_v1 = vpop.f32.mrb[24].mxu1 }
 0x652   : > { %1370 = vrot.lane.b32.xlu1 %v733_v1, %s2018_s12  ;;  %v1758_v3 = vpop.f32.mrb[25].mxu1 }
 0x653   : > { %v736_v4 = vpop.f32.mrb[26].mxu1 }
 0x654   : > { %v1759_v5 = vpop.f32.mrb[27].mxu1 }
 0x659   : > { %v838_v6 = vpop.f32.mrb[28].mxu1 }
 0x65a   : > { %1374 = vrot.lane.b32.xlu1 %v838_v6, %s2023_s17  ;;  %v1770_v7 = vpop.f32.mrb[29].mxu1  ;;  %s2364_s17 = scalar_lea.hbm %s2413_s6, %s1643_s29 }
 0x65b   : > { %v841_v8 = vpop.f32.mrb[30].mxu1 }
 0x65c   : > { %v1771_v9 = vpop.f32.mrb[31].mxu1 }
 0x661   : > { %v943_v10 = vpop.f32.mrb[32].mxu1 }
 0x662   : > { %1378 = vrot.lane.b32.xlu0 %v943_v10, %s2022_s16  ;;  %v1782_v11 = vpop.f32.mrb[33].mxu1 }
 0x663   : > { %v946_v12 = vpop.f32.mrb[34].mxu1 }
 0x664   : > { %v1783_v13 = vpop.f32.mrb[35].mxu1 }
 0x67f   : > { %v1048_v18 = vpop.f32.mrb[36].mxu1 }
 0x680   : > { %1382 = vrot.lane.b32.xlu1 %v1048_v18, %s2021_s15  ;;  %v1794_v20 = vpop.f32.mrb[37].mxu1  ;;  %s1955_s15 = sshll.u32 %s2024_s19, 4  ;;  %s1956_s15 = int_to_ptr.vmem [resolvable:$false] %s1955_s15 }
 0x681   : > { %v1051_v22 = vpop.f32.mrb[38].mxu1  ;;  %s1957_s20 = scalar_lea.vmem %s1956_s15, 256 }
 0x682   : > { %v1795_v23 = vpop.f32.mrb[39].mxu1 }
 0x68b   : > { %v1153_v26 = vpop.f32.mrb[40].mxu1 }
 0x68c   : > { %1386 = vrot.lane.b32.xlu0 %v1153_v26, %s2020_s14  ;;  %v1806_v27 = vpop.f32.mrb[41].mxu1 }
 0x68d   : > { %v1156_v28 = vpop.f32.mrb[42].mxu1 }
 0x68e   : > { %v1807_v29 = vpop.f32.mrb[43].mxu1 }
 0x693   : > { %v1258_v32 = vpop.f32.mrb[44].mxu1 }
 0x694   : > { %1390 = vrot.lane.b32.xlu1 %v1258_v32, %s2019_s13  ;;  %v1818_v33 = vpop.f32.mrb[45].mxu1 }
 0x695   : > { %v1261_v34 = vpop.f32.mrb[46].mxu1 }
 0x696   : > { %v1819_v35 = vpop.f32.mrb[47].mxu1 }
 0x69b   : > { %v1363_v31 = vpop.f32.mrb[48].mxu1 }
 0x69c   : > { %1394 = vrot.lane.b32.xlu0 %v1363_v31, %s2017_s11  ;;  %v1830_v36 = vpop.f32.mrb[49].mxu1  ;;  %s240_s11 = sand.u32 1, %s2005_s22  }
 0x69d   : > { %v1366_v37 = vpop.f32.mrb[50].mxu1  ;;  %s1599_s13 = sshll.u32 %s240_s11, 3  ;;  %s1523_s25 = scalar_lea.sflag [#allocation3], %s240_s11 }
 0x69e   : > { %v1831_v38 = vpop.f32.mrb[51].mxu1  ;;  %s242_s9 = scalar_lea.vmem [#allocation2], %s1599_s13 }
 0x69f   : > { %s1536_s10 = sshll.u32 %s242_s9, 4  ;;  %s2366_s10 = int_to_ptr.vmem [resolvable:$true] %s1536_s10 }
 0x6a0   : > { %s1951_s18 = scalar_lea.vmem %s2366_s10, 128  ;;  %p1958_p0 = scmp.lt.s32.totalorder %s2366_s10, %s1956_s15 }
 0x6a1   : > { %p1952_p11 = scmp.ne.s32.totalorder %s2366_s10, %s1951_s18  ;;  %p1959_p1 = scmp.lt.s32.totalorder %s1957_s20, %s1951_s18 }
 0x6a3   : > { %p1953_p12 = pnand %p1952_p11, %p2098_p5  ;;  %p1960_p2 = por %p1959_p1, %p1958_p0 }
 0x6a5   : > { %p1954_p13 = pneg %p1953_p12 }
 0x6a7   : > { %p1961_p3 = pnand %p1960_p2, %p1954_p13 }
 0x6c4   : > { %v1371_v39 = vpop.permute.xlu1 %1370 }
 0x6c5   : > { %v1397_v42 = vsel %vm528_vm3, %v2231_v19, %v1371_v39  ;;  %v1633_v19 = vld [vmem:[%s2412_s5] ss:$0 sm:$0xff] }
 0x6cc   : > { %v1375_v2 = vpop.permute.xlu1 %1374 }
 0x6cd   : > { %v1398_v43 = vsel %vm265_vm1, %v1397_v42, %v1375_v2 }
 0x6d4   : > { %v1379_v40 = vpop.permute.xlu0 %1378 }
 0x6d5   : > { %v1400_v45 = vsel %vm1399_vm5, %v1398_v43, %v1379_v40 }
 0x6f2   : > { %v1383_v41 = vpop.permute.xlu1 %1382 }
 0x6f3   : > { %v1402_v47 = vsel %vm1401_vm6, %v1400_v45, %v1383_v41 }
 0x6fe   : > { %v1387_v44 = vpop.permute.xlu0 %1386 }
 0x6ff   : > { %v1404_v48 = vsel %vm1403_vm7, %v1402_v47, %v1387_v44 }
 0x706   : > { %v1391_v46 = vpop.permute.xlu1 %1390 }
 0x707   : > { %v1406_v49 = vsel %vm1405_vm8, %v1404_v48, %v1391_v46 }
 0x70e   : > { %v1395_v50 = vpop.permute.xlu0 %1394 }
 0x70f   : > { %v1408_v51 = vsel %vm1407_vm9, %v1406_v49, %v1395_v50 }
 0x710   : > { %v1409_v52 = vpack.c.bf16 %v1408_v51, %v1408_v51 }
 0x712   : > { %1849 = vmatmul.mubr.bf16.vlgmr.msra.gmra.mrb[36].mxu0 %v1409_v52 }
 0x7e5   : > { %v1515_v53 = vpop.f32.mrb[36].mxu0 }
 0x7e6   : > { %v1516_v54 = vadd.f32 %v1633_v19, %v1515_v53  ;;  %v1850_v55 = vpop.f32.mrb[37].mxu0 }
 0x7e7   : > { %v1518_v56 = vpop.f32.mrb[38].mxu0 }
 0x7e8   : > { %v1851_v57 = vpop.f32.mrb[39].mxu0  ;;  %1521 = vst.msk [vmem:[%s242_s9] sm:$0xff] %vm265_vm1, %v1516_v54 }
 0x7e9   : > { %1964 = shalt.err (!%p1961_p3)
}
 0x7ea   : > { %s1965_s26 = scalar_lea.hbm %s2364_s17, 128  ;;  %s1969_s14 = scalar_lea.hbm %s2413_s6, 256 }
 0x7eb   : > { %p1966_p4 = scmp.ne.s32.totalorder %s2364_s17, %s1965_s26  ;;  %p1970_p9 = scmp.lt.u32.totalorder %s2364_s17, %s2413_s6 }
 0x7ec   : > { %p1971_p10 = scmp.lt.u32.totalorder %s1969_s14, %s1965_s26  ;;  %p1973_p12 = scmp.lt.u32.totalorder %s1965_s26, %s2364_s17 }
 0x7ed   : > { %p1967_p7 = pnand %p1966_p4, %p2098_p5 }
 0x7ee   : > { %p1972_p11 = por %p1971_p10, %p1970_p9 }
 0x7ef   : > { %p1968_p8 = pneg %p1967_p7 }
 0x7f0   : > { %p1974_p13 = por %p1973_p12, %p1972_p11 }
 0x7f2   : > { %p1975_p0 = pnand %p1974_p13, %p1968_p8 }
 0x7f4   : > { %1978 = shalt.err (!%p1975_p0)
}
 0x7f5   : > { %1856 = dma.vmem_to_hbm [thread:$0]  (%p2098_p5), %s2366_s10, 128, %s2364_s17, %s1523_s25  }
 0x7f6 PF: > { %p1862_p1 = scmp.ge.s32.totalorder %s2013_s24, 2  ;;  %s1548_s9 = sand.u32 1, %s2001_s21  }
 0x7f7   : > { %s1549_s12 = scalar_lea.sflag [#allocation3], %s1548_s9 }
 0x7f8   : > { %p1859_p2 = pnand %p1862_p1, %p2102_p6 }
 0x7fa   : > { %1996 = dma.done.wait (!%p1859_p2), %s1549_s12, 128  }
 0x7fb   : > { %1998 = vsyncadd (!%p1859_p2), %s1549_s12, 4294967168  ;;  %p16_p3 = scmp.ge.s32.totalorder %s2085_s27, 4   ;;  %s2416_s21 = smov %s2005_s22 }
 0x7fc   : > { %s2417_s22 = smov %s2009_s23  ;;  %s2418_s23 = smov %s2096_s30 }
 0x7fd   : > { %s2419_s24 = smov %s2085_s27  ;;  %18 = sbr.rel (!%p16_p3) target bundleno = 3 (0x3), region = 79 }
 0x804   :  { %1554 = vsyncpa [#allocation3], 1 }
 0x805   :  { %1556 = vsyncpa [#allocation3 + $0x1], 1 }

</bundles_post_ra>
